<compile_context>
chip_gen: v5e
topology: v5e:2x2
jax: 0.10.0
libtpu: 0.0.40
codegen_flags: <defaults>
</compile_context>

<pallas_src>
import jax
import jax.numpy as jnp
from jax.experimental import pallas as pl
from jax.experimental.pallas import tpu as pltpu

KH = KW = 3
STRIDE = 1
PAD = 1


def _round_up(x, m):
    return (x + m - 1) // m * m


def conv_bn_relu_kernel(a_ref, w_ref, scale_ref, shift_ref, o_ref, acc_ref):
    """Tiled matmul with fused eval-BatchNorm + ReLU epilogue.

    a_ref:     (tM, tK)  bf16 im2col activations
    w_ref:     (tK, tN)  bf16 reshaped conv weights
    scale_ref: (1, tN)   f32 folded BN scale
    shift_ref: (1, tN)   f32 folded BN shift
    o_ref:     (tM, tN)  output tile (lane-dense, tN % 128 == 0)
    acc_ref:   (tM, tN)  f32 VMEM accumulator
    """
    k = pl.program_id(2)

    @pl.when(k == 0)
    def _():
        acc_ref[...] = jnp.zeros_like(acc_ref)

    acc_ref[...] += jnp.dot(a_ref[...], w_ref[...],
                            preferred_element_type=jnp.float32)

    @pl.when(k == pl.num_programs(2) - 1)
    def _():
        y = acc_ref[...] * scale_ref[...] + shift_ref[...]      # folded BN (eval)
        o_ref[...] = jnp.maximum(y, 0.0).astype(o_ref.dtype)    # ReLU


def basic_conv_forward(x_nchw, weight_oihw, gamma, beta, running_mean,
                       running_var, eps=1e-5):
    """BasicConv.forward for kernel_size=3, stride=1, padding=1, dilation=1,
    groups=1, bias=False, pooling=None, batchnorm=True (eval), act=ReLU."""
    B, Cin, H, W = x_nchw.shape
    Cout = weight_oihw.shape[0]
    out_dtype = x_nchw.dtype

    # ---- glue: NCHW -> NHWC, zero pad, im2col to (B*H*W, 9*Cin), bf16 ----
    x_nhwc = jnp.transpose(x_nchw, (0, 2, 3, 1)).astype(jnp.bfloat16)
    x_pad = jnp.pad(x_nhwc, ((0, 0), (PAD, PAD), (PAD, PAD), (0, 0)))
    taps = [x_pad[:, kh:kh + H, kw:kw + W, :]
            for kh in range(KH) for kw in range(KW)]
    cols = jnp.concatenate(taps, axis=-1)                   # (B, H, W, 9*Cin)
    a = cols.reshape(B * H * W, KH * KW * Cin)

    # Weights: OIHW -> (kh, kw, cin) x Cout, matching the tap concat order.
    w2d = jnp.transpose(weight_oihw, (2, 3, 1, 0)).reshape(
        KH * KW * Cin, Cout).astype(jnp.bfloat16)

    # Fold eval-mode BatchNorm into per-channel scale/shift (f32 epilogue).
    inv_std = 1.0 / jnp.sqrt(running_var.astype(jnp.float32) + eps)
    scale = (gamma.astype(jnp.float32) * inv_std).reshape(1, Cout)
    shift = (beta.astype(jnp.float32)
             - running_mean.astype(jnp.float32)
             * gamma.astype(jnp.float32) * inv_std).reshape(1, Cout)

    # ---- pad to MXU-friendly, lane-dense tiles ----
    M, K = a.shape
    tM = 256
    Kp = _round_up(K, 128)
    Np = _round_up(Cout, 128)
    tK = 512 if Kp % 512 == 0 else (256 if Kp % 256 == 0 else 128)
    tN = 256 if Np % 256 == 0 else 128
    Mp = _round_up(M, tM)

    a = jnp.pad(a, ((0, Mp - M), (0, Kp - K)))
    w2d = jnp.pad(w2d, ((0, Kp - K), (0, Np - Cout)))
    scale = jnp.pad(scale, ((0, 0), (0, Np - Cout)))
    shift = jnp.pad(shift, ((0, 0), (0, Np - Cout)))

    grid = (Mp // tM, Np // tN, Kp // tK)

    out2d = pl.pallas_call(
        conv_bn_relu_kernel,
        out_shape=jax.ShapeDtypeStruct((Mp, Np), out_dtype),
        grid_spec=pltpu.PrefetchScalarGridSpec(
            num_scalar_prefetch=0,
            grid=grid,
            in_specs=[
                pl.BlockSpec((tM, tK), lambda i, j, k: (i, k)),
                pl.BlockSpec((tK, tN), lambda i, j, k: (k, j)),
                pl.BlockSpec((1, tN), lambda i, j, k: (0, j)),
                pl.BlockSpec((1, tN), lambda i, j, k: (0, j)),
            ],
            out_specs=pl.BlockSpec((tM, tN), lambda i, j, k: (i, j)),
            scratch_shapes=[pltpu.VMEM((tM, tN), jnp.float32)],
        ),
        compiler_params=pltpu.CompilerParams(
            dimension_semantics=("parallel", "parallel", "arbitrary"),
            vmem_limit_bytes=32 * 1024 * 1024),
    )(a, w2d, scale, shift)

    out = out2d[:M, :Cout].reshape(B, H, W, Cout)
    return jnp.transpose(out, (0, 3, 1, 2))                 # NHWC -> NCHW


if __name__ == "__main__":
    key = jax.random.PRNGKey(0)
    k_x, k_w, k_g, k_b, k_m, k_v = jax.random.split(key, 6)

    B, Cin, Cout, H, W = 2, 4, 8, 16, 16

    x = jax.random.normal(k_x, (B, Cin, H, W), dtype=jnp.float32)
    weight = jax.random.normal(k_w, (Cout, Cin, KH, KW), dtype=jnp.float32) * 0.1
    gamma = 1.0 + 0.1 * jax.random.normal(k_g, (Cout,), dtype=jnp.float32)
    beta = 0.1 * jax.random.normal(k_b, (Cout,), dtype=jnp.float32)
    running_mean = 0.05 * jax.random.normal(k_m, (Cout,), dtype=jnp.float32)
    running_var = jnp.abs(1.0 + 0.1 * jax.random.normal(k_v, (Cout,),
                                                        dtype=jnp.float32))

    fwd = jax.jit(basic_conv_forward)
    out = fwd(x, weight, gamma, beta, running_mean, running_var)
    jax.block_until_ready(out)

    # Reference: lax conv with the same bf16 operands / f32 accumulation,
    # then eval-mode BatchNorm + ReLU in f32.
    ref = jax.lax.conv_general_dilated(
        x.astype(jnp.bfloat16), weight.astype(jnp.bfloat16),
        window_strides=(1, 1), padding=((PAD, PAD), (PAD, PAD)),
        dimension_numbers=("NCHW", "OIHW", "NCHW"),
        preferred_element_type=jnp.float32)
    inv_std = 1.0 / jnp.sqrt(running_var + 1e-5)
    ref = (ref - running_mean[None, :, None, None]) \
          * (gamma * inv_std)[None, :, None, None] + beta[None, :, None, None]
    ref = jnp.maximum(ref, 0.0).astype(x.dtype)

    assert out.shape == (B, Cout, H, W)
    assert jnp.allclose(out, ref, atol=2e-3, rtol=2e-3), \
        float(jnp.max(jnp.abs(out - ref)))

    print("KERNEL_OK")
</pallas_src>

<mosaic_0001>
module attributes {stable_mosaic.version = 11 : i64} {
  func.func @conv_bn_relu_kernel(%arg0: i32, %arg1: i32, %arg2: i32, %arg3: memref<256x128xbf16, #tpu.memory_space<vmem>>, %arg4: memref<128x128xbf16, #tpu.memory_space<vmem>>, %arg5: memref<1x128xf32, #tpu.memory_space<vmem>>, %arg6: memref<1x128xf32, #tpu.memory_space<vmem>>, %arg7: memref<256x128xf32, #tpu.memory_space<vmem>>, %arg8: memref<256x128xf32, #tpu.memory_space<vmem>>) attributes {dimension_semantics = [#tpu.dimension_semantics<parallel>, #tpu.dimension_semantics<parallel>, #tpu.dimension_semantics<arbitrary>], iteration_bounds = array<i64: 2, 1, 1>, scalar_prefetch = 0 : i64, scratch_operands = 1 : i64, tpu.core_type = #tpu.core_type<tc>, window_params = [{transform_indices = @transform_0, window_bounds = array<i64: 256, 128>}, {transform_indices = @transform_1, window_bounds = array<i64: 128, 128>}, {transform_indices = @transform_2, window_bounds = array<i64: 1, 128>}, {transform_indices = @transform_3, window_bounds = array<i64: 1, 128>}, {transform_indices = @transform_4, window_bounds = array<i64: 256, 128>}]} {
    %c0_i32 = arith.constant 0 : i32
    %0 = arith.cmpi eq, %arg2, %c0_i32 : i32
    %1 = arith.extui %0 : i1 to i32
    %c0_i32_0 = arith.constant 0 : i32
    %2 = arith.cmpi ne, %1, %c0_i32_0 : i32
    scf.if %2 {
      %cst_10 = arith.constant 0.000000e+00 : f32
      %12 = vector.broadcast %cst_10 : f32 to vector<256x128xf32>
      %c0_11 = arith.constant 0 : index
      %c0_12 = arith.constant 0 : index
      %13 = vector.load %arg8[%c0_11, %c0_12] : memref<256x128xf32, #tpu.memory_space<vmem>>, vector<256x128xf32>
      tpu.vector_store %arg8[%c0_11, %c0_12], %12 {strides = array<i32>} : memref<256x128xf32, #tpu.memory_space<vmem>>, vector<256x128xf32>,
    } else {
    }
    %c0 = arith.constant 0 : index
    %c0_1 = arith.constant 0 : index
    %3 = vector.load %arg8[%c0, %c0_1] : memref<256x128xf32, #tpu.memory_space<vmem>>, vector<256x128xf32>
    %c0_2 = arith.constant 0 : index
    %c0_3 = arith.constant 0 : index
    %4 = vector.load %arg3[%c0_2, %c0_3] : memref<256x128xbf16, #tpu.memory_space<vmem>>, vector<256x128xbf16>
    %c0_4 = arith.constant 0 : index
    %c0_5 = arith.constant 0 : index
    %5 = vector.load %arg4[%c0_4, %c0_5] : memref<128x128xbf16, #tpu.memory_space<vmem>>, vector<128x128xbf16>
    %cst = arith.constant dense<0.000000e+00> : vector<256x128xf32>
    %6 = tpu.matmul %4, %5, %cst {dimension_numbers = #tpu.dot_dimension_numbers<[1], [0], [0], [1], [0, 0, 1, 1], [], []>} : vector<256x128xbf16>, vector<128x128xbf16>, vector<256x128xf32> -> vector<256x128xf32>
    %7 = arith.addf %3, %6 : vector<256x128xf32>
    %c0_6 = arith.constant 0 : index
    %c0_7 = arith.constant 0 : index
    %8 = vector.load %arg8[%c0_6, %c0_7] : memref<256x128xf32, #tpu.memory_space<vmem>>, vector<256x128xf32>
    tpu.vector_store %arg8[%c0_6, %c0_7], %7 {strides = array<i32>} : memref<256x128xf32, #tpu.memory_space<vmem>>, vector<256x128xf32>,
    %c0_i32_8 = arith.constant 0 : i32
    %9 = arith.cmpi eq, %arg2, %c0_i32_8 : i32
    %10 = arith.extui %9 : i1 to i32
    %c0_i32_9 = arith.constant 0 : i32
    %11 = arith.cmpi ne, %10, %c0_i32_9 : i32
    scf.if %11 {
      %c0_10 = arith.constant 0 : index
      %c0_11 = arith.constant 0 : index
      %12 = vector.load %arg8[%c0_10, %c0_11] : memref<256x128xf32, #tpu.memory_space<vmem>>, vector<256x128xf32>
      %c0_12 = arith.constant 0 : index
      %c0_13 = arith.constant 0 : index
      %13 = vector.load %arg5[%c0_12, %c0_13] : memref<1x128xf32, #tpu.memory_space<vmem>>, vector<1x128xf32>
      %14 = vector.broadcast %13 : vector<1x128xf32> to vector<256x128xf32>
      %15 = arith.mulf %12, %14 : vector<256x128xf32>
      %c0_14 = arith.constant 0 : index
      %c0_15 = arith.constant 0 : index
      %16 = vector.load %arg6[%c0_14, %c0_15] : memref<1x128xf32, #tpu.memory_space<vmem>>, vector<1x128xf32>
      %17 = vector.broadcast %16 : vector<1x128xf32> to vector<256x128xf32>
      %18 = arith.addf %15, %17 : vector<256x128xf32>
      %cst_16 = arith.constant 0.000000e+00 : f32
      %19 = vector.broadcast %cst_16 : f32 to vector<256x128xf32>
      %20 = arith.maximumf %18, %19 : vector<256x128xf32>
      %c0_17 = arith.constant 0 : index
      %c0_18 = arith.constant 0 : index
      %21 = vector.load %arg7[%c0_17, %c0_18] : memref<256x128xf32, #tpu.memory_space<vmem>>, vector<256x128xf32>
      tpu.vector_store %arg7[%c0_17, %c0_18], %20 {strides = array<i32>} : memref<256x128xf32, #tpu.memory_space<vmem>>, vector<256x128xf32>,
    } else {
    }
    return
  }
  func.func @transform_0(%arg0: i32, %arg1: i32, %arg2: i32) -> (i32, i32) {
    %c0_i32 = arith.constant 0 : i32
    return %arg0, %arg2 : i32, i32
  }
  func.func @transform_1(%arg0: i32, %arg1: i32, %arg2: i32) -> (i32, i32) {
    %c0_i32 = arith.constant 0 : i32
    return %arg2, %arg1 : i32, i32
  }
  func.func @transform_2(%arg0: i32, %arg1: i32, %arg2: i32) -> (i32, i32) {
    %c0_i32 = arith.constant 0 : i32
    %c0_i32_0 = arith.constant 0 : i32
    return %c0_i32, %arg1 : i32, i32
  }
  func.func @transform_3(%arg0: i32, %arg1: i32, %arg2: i32) -> (i32, i32) {
    %c0_i32 = arith.constant 0 : i32
    %c0_i32_0 = arith.constant 0 : i32
    return %c0_i32, %arg1 : i32, i32
  }
  func.func @transform_4(%arg0: i32, %arg1: i32, %arg2: i32) -> (i32, i32) {
    %c0_i32 = arith.constant 0 : i32
    return %arg0, %arg1 : i32, i32
  }
}

</mosaic_0001>

<bundles_post_ra>
// kernel: basic_conv_forward.1
= control target key start
LH: loop header
LB: loop body
LE: loop exit
PB: predicated region body
PF: predicated region fallthrough
CT: control target
= control target key end

     0   :  { %s1240_s15 = smov 0   ;;  %s1242_s16 = smov 0   ;;  %s1430_s0 = inlined_call_operand.vmem [shape: bf16[512,128], index: 0, kind: input, shape index: {}]   ;;  %s1431_s1 = inlined_call_operand.vmem [shape: bf16[128,128], index: 1, kind: input, shape index: {}]   ;;  %s1432_s2 = inlined_call_operand.vmem [shape: f32[1,128], index: 2, kind: input, shape index: {}]   ;;  %s1433_s3 = inlined_call_operand.vmem [shape: f32[1,128], index: 3, kind: input, shape index: {}]   ;;  %s1434_s4 = inlined_call_operand.vmem [shape: f32[512,128], index: 4, kind: output, shape index: {}]  }
   0x1   :  { %s1244_s17 = smov 0  }
   0x2 LB: > { %s33_s18 = sadd.s32 1, %s1209_s16  ;;  %p1014_p0 = scmp.ge.s32.totalorder %s1213_s17, 1  ;;  %s1213_s17 = sphi %s1244_s17, %s14_s17   ;;  %s1209_s16 = sphi %s1242_s16, %s1436_s16   ;;  %s1205_s15 = sphi %s1240_s15, %s1435_s15  }
   0x3   : > { %p35_p1 = scmp.ge.s32.totalorder %s33_s18, 2  ;;  %p221_p2 = scmp.lt.s32.totalorder %s1213_s17, 3 }
   0x5   : > { %s1438_s18 = smov (%p35_p1, %s33_s18), 0  ;;  %p222_p3 = pnand %p1014_p0, %p221_p2 }
   0x6   : > { %s1015_s27 = sshll.u32 (!%p222_p3), %s1205_s15, 5 }
   0x7   : > { %225 = sbr.rel (%p222_p3) target bundleno = 241 (0xf1), region = 36  ;;  %p268_p4 = scmp.lt.s32.totalorder (!%p222_p3), %s1015_s27, 63 }
   0xc   : > { %v1140_v0 = vld [vmem:[%s1431_s1 + $0x38] sm:$0xff]  ;;  %v1139_v1 = vld [vmem:[%s1431_s1 + $0x30] sm:$0xff]  ;;  %v1138_v2 = vld [vmem:[%s1431_s1 + $0x28] sm:$0xff]  ;;  %s1440_s27 = smov (!%p268_p4, %s1015_s27), 63 }
   0xd   : > { %560 = vmatpush.bf16.msra.mxu0 %v1140_v0  ;;  %1141 = vmatpush.bf16.msra.mxu1 %v1140_v0  ;;  %v1137_v3 = vld [vmem:[%s1431_s1 + $0x20] sm:$0xff]  ;;  %v1136_v4 = vld [vmem:[%s1431_s1 + $0x18] sm:$0xff]  ;;  %v1135_v5 = vld [vmem:[%s1431_s1 + $0x10] sm:$0xff]  ;;  %s1016_s8 = sshll.u32 %s1440_s27, 2  ;;  %s1018_s21 = sshll.u32 %s1440_s27, 3 }
   0xe   : > { %1142 = vmatpush.bf16.msra.mxu2 %v1140_v0  ;;  %1143 = vmatpush.bf16.msra.mxu3 %v1140_v0  ;;  %v1134_v6 = vld [vmem:[%s1431_s1 + $0x8] sm:$0xff]  ;;  %v1133_v7 = vld [vmem:[%s1431_s1] sm:$0xff]  ;;  %s1291_s13 = scalar_lea.vmem %s1430_s0, %s1016_s8  ;;  %s1327_s24 = scalar_lea.vmem %s1434_s4, %s1018_s21 }
   0xf   : > { %v1117_v8 = vld [vmem:[%s1291_s13] sm:$0xff]  ;;  %v1118_v12 = vld [vmem:[%s1291_s13 + $0x8] sm:$0xff]  ;;  %v1119_v16 = vld [vmem:[%s1291_s13 + $0x10] sm:$0xff] }
  0x10   : > { %v1121_v9 = vld [vmem:[%s1291_s13 + $0x20] sm:$0xff]  ;;  %v1122_v13 = vld [vmem:[%s1291_s13 + $0x28] sm:$0xff]  ;;  %v1123_v17 = vld [vmem:[%s1291_s13 + $0x30] sm:$0xff] }
  0x11   : > { %561 = vmatpush.bf16.msra.mxu0 %v1139_v1  ;;  %1144 = vmatpush.bf16.msra.mxu1 %v1139_v1  ;;  %v1125_v10 = vld [vmem:[%s1291_s13 + $0x40] sm:$0xff]  ;;  %v1126_v14 = vld [vmem:[%s1291_s13 + $0x48] sm:$0xff]  ;;  %v1127_v18 = vld [vmem:[%s1291_s13 + $0x50] sm:$0xff] }
  0x12   : > { %1145 = vmatpush.bf16.msra.mxu2 %v1139_v1  ;;  %1146 = vmatpush.bf16.msra.mxu3 %v1139_v1  ;;  %v1129_v11 = vld [vmem:[%s1291_s13 + $0x60] sm:$0xff]  ;;  %v1130_v15 = vld [vmem:[%s1291_s13 + $0x68] sm:$0xff]  ;;  %v1131_v19 = vld [vmem:[%s1291_s13 + $0x70] sm:$0xff] }
  0x13   : > { %v1120_v20 = vld [vmem:[%s1291_s13 + $0x18] sm:$0xff]  ;;  %v1312_v24 = vld [vmem:[%s1432_s2] ss:$0 sm:$0xff] }
  0x14   : > { %v1124_v21 = vld [vmem:[%s1291_s13 + $0x38] sm:$0xff]  ;;  %v1317_v25 = vld [vmem:[%s1433_s3] ss:$0 sm:$0xff] }
  0x15   : > { %562 = vmatpush.bf16.msra.mxu0 %v1138_v2  ;;  %1147 = vmatpush.bf16.msra.mxu1 %v1138_v2  ;;  %v1128_v22 = vld [vmem:[%s1291_s13 + $0x58] sm:$0xff] }
  0x16   : > { %1148 = vmatpush.bf16.msra.mxu2 %v1138_v2  ;;  %1149 = vmatpush.bf16.msra.mxu3 %v1138_v2  ;;  %v1132_v23 = vld [vmem:[%s1291_s13 + $0x78] sm:$0xff] }
  0x19   : > { %563 = vmatpush.bf16.msra.mxu0 %v1137_v3  ;;  %1150 = vmatpush.bf16.msra.mxu1 %v1137_v3 }
  0x1a   : > { %1151 = vmatpush.bf16.msra.mxu2 %v1137_v3  ;;  %1152 = vmatpush.bf16.msra.mxu3 %v1137_v3 }
  0x1d   : > { %564 = vmatpush.bf16.msra.mxu0 %v1136_v4  ;;  %1153 = vmatpush.bf16.msra.mxu1 %v1136_v4 }
  0x1e   : > { %1154 = vmatpush.bf16.msra.mxu2 %v1136_v4  ;;  %1155 = vmatpush.bf16.msra.mxu3 %v1136_v4 }
  0x21   : > { %565 = vmatpush.bf16.msra.mxu0 %v1135_v5  ;;  %1156 = vmatpush.bf16.msra.mxu1 %v1135_v5 }
  0x22   : > { %1157 = vmatpush.bf16.msra.mxu2 %v1135_v5  ;;  %1158 = vmatpush.bf16.msra.mxu3 %v1135_v5 }
  0x25   : > { %566 = vmatpush.bf16.msra.mxu0 %v1134_v6  ;;  %1159 = vmatpush.bf16.msra.mxu1 %v1134_v6 }
  0x26   : > { %1160 = vmatpush.bf16.msra.mxu2 %v1134_v6  ;;  %1161 = vmatpush.bf16.msra.mxu3 %v1134_v6 }
  0x29   : > { %567 = vmatpush.bf16.msra.mxu0 %v1133_v7  ;;  %1162 = vmatpush.bf16.msra.mxu1 %v1133_v7 }
  0x2a   : > { %1163 = vmatpush.bf16.msra.mxu2 %v1133_v7  ;;  %1164 = vmatpush.bf16.msra.mxu3 %v1133_v7 }
  0x2c   : > { %568 = vmatmul.bf16.vlgmr.msra.gmra.mxu0 %v1117_v8  ;;  %588 = vmatmul.bf16.vlgmr.msra.gmra.mxu1 %v1121_v9 }
  0x2d   : > { %608 = vmatmul.bf16.vlgmr.msra.gmra.mxu2 %v1125_v10  ;;  %628 = vmatmul.bf16.vlgmr.msra.gmra.mxu3 %v1129_v11 }
  0x3c   : > { %573 = vmatmul.bf16.gmra.mxu0 %v1118_v12  ;;  %593 = vmatmul.bf16.gmra.mxu1 %v1122_v13 }
  0x3d   : > { %613 = vmatmul.bf16.gmra.mxu2 %v1126_v14  ;;  %633 = vmatmul.bf16.gmra.mxu3 %v1130_v15 }
  0x4c   : > { %578 = vmatmul.bf16.gmra.mxu0 %v1119_v16  ;;  %598 = vmatmul.bf16.gmra.mxu1 %v1123_v17 }
  0x4d   : > { %618 = vmatmul.bf16.gmra.mxu2 %v1127_v18  ;;  %638 = vmatmul.bf16.gmra.mxu3 %v1131_v19 }
  0x5c   : > { %583 = vmatmul.bf16.gmra.mxu0 %v1120_v20  ;;  %603 = vmatmul.bf16.gmra.mxu1 %v1124_v21 }
  0x5d   : > { %623 = vmatmul.bf16.gmra.mxu2 %v1128_v22  ;;  %643 = vmatmul.bf16.gmra.mxu3 %v1132_v23 }
  0xa9   : > { %v569_v26 = vpop.f32.mrf.mxu0  ;;  %v589_v27 = vpop.f32.mrf.mxu1 }
  0xaa   : > { %v752_v28 = vmul.f32 %v1312_v24, %v569_v26  ;;  %v760_v29 = vmul.f32 %v1312_v24, %v589_v27 }
  0xac   : > { %v788_v30 = vadd.f32 %v1317_v25, %v752_v28  ;;  %v796_v31 = vadd.f32 %v1317_v25, %v760_v29 }
  0xae   : > { %v820_v32 = vmax.f32 %v788_v30, 0.0  ;;  %v828_v33 = vmax.f32 %v796_v31, 0.0 }
  0xb0   : > { %852 = vst [vmem:[%s1327_s24] sm:$0xff] %v820_v32  ;;  %v609_v34 = vpop.f32.mrf.mxu2  ;;  %v629_v35 = vpop.f32.mrf.mxu3 }
  0xb1   : > { %860 = vst [vmem:[%s1327_s24 + $0x40] sm:$0xff] %v828_v33  ;;  %v768_v36 = vmul.f32 %v1312_v24, %v609_v34  ;;  %v776_v37 = vmul.f32 %v1312_v24, %v629_v35  ;;  %v571_v38 = vpop.f32.mrf.mxu0  ;;  %v591_v39 = vpop.f32.mrf.mxu1 }
  0xb2   : > { %v753_v40 = vmul.f32 %v1312_v24, %v571_v38  ;;  %v761_v41 = vmul.f32 %v1312_v24, %v591_v39 }
  0xb3   : > { %v804_v42 = vadd.f32 %v1317_v25, %v768_v36  ;;  %v812_v43 = vadd.f32 %v1317_v25, %v776_v37 }
  0xb4   : > { %v789_v44 = vadd.f32 %v1317_v25, %v753_v40  ;;  %v797_v45 = vadd.f32 %v1317_v25, %v761_v41 }
  0xb5   : > { %v836_v46 = vmax.f32 %v804_v42, 0.0  ;;  %v844_v47 = vmax.f32 %v812_v43, 0.0 }
  0xb6   : > { %v821_v48 = vmax.f32 %v789_v44, 0.0  ;;  %v829_v49 = vmax.f32 %v797_v45, 0.0 }
  0xb7   : > { %868 = vst [vmem:[%s1327_s24 + $0x80] sm:$0xff] %v836_v46 }
  0xb8   : > { %876 = vst [vmem:[%s1327_s24 + $0xc0] sm:$0xff] %v844_v47  ;;  %v611_v50 = vpop.f32.mrf.mxu2  ;;  %v631_v51 = vpop.f32.mrf.mxu3 }
  0xb9   : > { %853 = vst [vmem:[%s1327_s24 + $0x8] sm:$0xff] %v821_v48  ;;  %v769_v52 = vmul.f32 %v1312_v24, %v611_v50  ;;  %v777_v53 = vmul.f32 %v1312_v24, %v631_v51  ;;  %v574_v54 = vpop.f32.mrf.mxu0  ;;  %v594_v55 = vpop.f32.mrf.mxu1 }
  0xba   : > { %861 = vst [vmem:[%s1327_s24 + $0x48] sm:$0xff] %v829_v49  ;;  %v754_v56 = vmul.f32 %v1312_v24, %v574_v54  ;;  %v762_v57 = vmul.f32 %v1312_v24, %v594_v55 }
  0xbb   : > { %v805_v58 = vadd.f32 %v1317_v25, %v769_v52  ;;  %v813_v59 = vadd.f32 %v1317_v25, %v777_v53 }
  0xbc   : > { %v790_v60 = vadd.f32 %v1317_v25, %v754_v56  ;;  %v798_v61 = vadd.f32 %v1317_v25, %v762_v57 }
  0xbd   : > { %v837_v62 = vmax.f32 %v805_v58, 0.0  ;;  %v845_v63 = vmax.f32 %v813_v59, 0.0 }
  0xbe   : > { %v822_v0 = vmax.f32 %v790_v60, 0.0  ;;  %v830_v1 = vmax.f32 %v798_v61, 0.0 }
  0xbf   : > { %869 = vst [vmem:[%s1327_s24 + $0x88] sm:$0xff] %v837_v62 }
  0xc0   : > { %877 = vst [vmem:[%s1327_s24 + $0xc8] sm:$0xff] %v845_v63  ;;  %v614_v2 = vpop.f32.mrf.mxu2  ;;  %v634_v3 = vpop.f32.mrf.mxu3 }
  0xc1   : > { %854 = vst [vmem:[%s1327_s24 + $0x10] sm:$0xff] %v822_v0  ;;  %v770_v4 = vmul.f32 %v1312_v24, %v614_v2  ;;  %v778_v5 = vmul.f32 %v1312_v24, %v634_v3  ;;  %v576_v6 = vpop.f32.mrf.mxu0  ;;  %v596_v7 = vpop.f32.mrf.mxu1 }
  0xc2   : > { %862 = vst [vmem:[%s1327_s24 + $0x50] sm:$0xff] %v830_v1  ;;  %v755_v8 = vmul.f32 %v1312_v24, %v576_v6  ;;  %v763_v9 = vmul.f32 %v1312_v24, %v596_v7 }
  0xc3   : > { %v806_v10 = vadd.f32 %v1317_v25, %v770_v4  ;;  %v814_v11 = vadd.f32 %v1317_v25, %v778_v5 }
  0xc4   : > { %v791_v12 = vadd.f32 %v1317_v25, %v755_v8  ;;  %v799_v13 = vadd.f32 %v1317_v25, %v763_v9 }
  0xc5   : > { %v838_v14 = vmax.f32 %v806_v10, 0.0  ;;  %v846_v15 = vmax.f32 %v814_v11, 0.0 }
  0xc6   : > { %v823_v16 = vmax.f32 %v791_v12, 0.0  ;;  %v831_v17 = vmax.f32 %v799_v13, 0.0 }
  0xc7   : > { %870 = vst [vmem:[%s1327_s24 + $0x90] sm:$0xff] %v838_v14 }
  0xc8   : > { %878 = vst [vmem:[%s1327_s24 + $0xd0] sm:$0xff] %v846_v15  ;;  %v616_v18 = vpop.f32.mrf.mxu2  ;;  %v636_v19 = vpop.f32.mrf.mxu3 }
  0xc9   : > { %855 = vst [vmem:[%s1327_s24 + $0x18] sm:$0xff] %v823_v16  ;;  %v771_v20 = vmul.f32 %v1312_v24, %v616_v18  ;;  %v779_v21 = vmul.f32 %v1312_v24, %v636_v19  ;;  %v579_v22 = vpop.f32.mrf.mxu0  ;;  %v599_v23 = vpop.f32.mrf.mxu1 }
  0xca   : > { %863 = vst [vmem:[%s1327_s24 + $0x58] sm:$0xff] %v831_v17  ;;  %v756_v26 = vmul.f32 %v1312_v24, %v579_v22  ;;  %v764_v27 = vmul.f32 %v1312_v24, %v599_v23 }
  0xcb   : > { %v807_v28 = vadd.f32 %v1317_v25, %v771_v20  ;;  %v815_v29 = vadd.f32 %v1317_v25, %v779_v21 }
  0xcc   : > { %v792_v30 = vadd.f32 %v1317_v25, %v756_v26  ;;  %v800_v31 = vadd.f32 %v1317_v25, %v764_v27 }
  0xcd   : > { %v839_v32 = vmax.f32 %v807_v28, 0.0  ;;  %v847_v33 = vmax.f32 %v815_v29, 0.0 }
  0xce   : > { %v824_v34 = vmax.f32 %v792_v30, 0.0  ;;  %v832_v35 = vmax.f32 %v800_v31, 0.0 }
  0xcf   : > { %871 = vst [vmem:[%s1327_s24 + $0x98] sm:$0xff] %v839_v32 }
  0xd0   : > { %879 = vst [vmem:[%s1327_s24 + $0xd8] sm:$0xff] %v847_v33  ;;  %v619_v36 = vpop.f32.mrf.mxu2  ;;  %v639_v37 = vpop.f32.mrf.mxu3 }
  0xd1   : > { %856 = vst [vmem:[%s1327_s24 + $0x20] sm:$0xff] %v824_v34  ;;  %v772_v38 = vmul.f32 %v1312_v24, %v619_v36  ;;  %v780_v39 = vmul.f32 %v1312_v24, %v639_v37  ;;  %v581_v40 = vpop.f32.mrf.mxu0  ;;  %v601_v41 = vpop.f32.mrf.mxu1 }
  0xd2   : > { %864 = vst [vmem:[%s1327_s24 + $0x60] sm:$0xff] %v832_v35  ;;  %v757_v42 = vmul.f32 %v1312_v24, %v581_v40  ;;  %v765_v43 = vmul.f32 %v1312_v24, %v601_v41 }
  0xd3   : > { %v808_v44 = vadd.f32 %v1317_v25, %v772_v38  ;;  %v816_v45 = vadd.f32 %v1317_v25, %v780_v39 }
  0xd4   : > { %v793_v46 = vadd.f32 %v1317_v25, %v757_v42  ;;  %v801_v47 = vadd.f32 %v1317_v25, %v765_v43 }
  0xd5   : > { %v840_v48 = vmax.f32 %v808_v44, 0.0  ;;  %v848_v49 = vmax.f32 %v816_v45, 0.0 }
  0xd6   : > { %v825_v50 = vmax.f32 %v793_v46, 0.0  ;;  %v833_v51 = vmax.f32 %v801_v47, 0.0 }
  0xd7   : > { %872 = vst [vmem:[%s1327_s24 + $0xa0] sm:$0xff] %v840_v48 }
  0xd8   : > { %880 = vst [vmem:[%s1327_s24 + $0xe0] sm:$0xff] %v848_v49  ;;  %v621_v52 = vpop.f32.mrf.mxu2  ;;  %v641_v53 = vpop.f32.mrf.mxu3 }
  0xd9   : > { %857 = vst [vmem:[%s1327_s24 + $0x28] sm:$0xff] %v825_v50  ;;  %v773_v54 = vmul.f32 %v1312_v24, %v621_v52  ;;  %v781_v55 = vmul.f32 %v1312_v24, %v641_v53  ;;  %v584_v56 = vpop.f32.mrf.mxu0  ;;  %v604_v57 = vpop.f32.mrf.mxu1 }
  0xda   : > { %865 = vst [vmem:[%s1327_s24 + $0x68] sm:$0xff] %v833_v51  ;;  %v758_v58 = vmul.f32 %v1312_v24, %v584_v56  ;;  %v766_v59 = vmul.f32 %v1312_v24, %v604_v57 }
  0xdb   : > { %v809_v60 = vadd.f32 %v1317_v25, %v773_v54  ;;  %v817_v61 = vadd.f32 %v1317_v25, %v781_v55 }
  0xdc   : > { %v794_v62 = vadd.f32 %v1317_v25, %v758_v58  ;;  %v802_v63 = vadd.f32 %v1317_v25, %v766_v59 }
  0xdd   : > { %v841_v0 = vmax.f32 %v809_v60, 0.0  ;;  %v849_v1 = vmax.f32 %v817_v61, 0.0 }
  0xde   : > { %v826_v2 = vmax.f32 %v794_v62, 0.0  ;;  %v834_v3 = vmax.f32 %v802_v63, 0.0 }
  0xdf   : > { %873 = vst [vmem:[%s1327_s24 + $0xa8] sm:$0xff] %v841_v0 }
  0xe0   : > { %881 = vst [vmem:[%s1327_s24 + $0xe8] sm:$0xff] %v849_v1  ;;  %v624_v4 = vpop.f32.mrf.mxu2  ;;  %v644_v5 = vpop.f32.mrf.mxu3 }
  0xe1   : > { %858 = vst [vmem:[%s1327_s24 + $0x30] sm:$0xff] %v826_v2  ;;  %v774_v6 = vmul.f32 %v1312_v24, %v624_v4  ;;  %v782_v7 = vmul.f32 %v1312_v24, %v644_v5  ;;  %v586_v8 = vpop.f32.mrf.mxu0  ;;  %v606_v9 = vpop.f32.mrf.mxu1 }
  0xe2   : > { %866 = vst [vmem:[%s1327_s24 + $0x70] sm:$0xff] %v834_v3  ;;  %v759_v10 = vmul.f32 %v1312_v24, %v586_v8  ;;  %v767_v11 = vmul.f32 %v1312_v24, %v606_v9 }
  0xe3   : > { %v810_v12 = vadd.f32 %v1317_v25, %v774_v6  ;;  %v818_v13 = vadd.f32 %v1317_v25, %v782_v7 }
  0xe4   : > { %v795_v14 = vadd.f32 %v1317_v25, %v759_v10  ;;  %v803_v15 = vadd.f32 %v1317_v25, %v767_v11 }
  0xe5   : > { %v842_v16 = vmax.f32 %v810_v12, 0.0  ;;  %v850_v17 = vmax.f32 %v818_v13, 0.0 }
  0xe6   : > { %v827_v18 = vmax.f32 %v795_v14, 0.0  ;;  %v835_v19 = vmax.f32 %v803_v15, 0.0 }
  0xe7   : > { %874 = vst [vmem:[%s1327_s24 + $0xb0] sm:$0xff] %v842_v16 }
  0xe8   : > { %882 = vst [vmem:[%s1327_s24 + $0xf0] sm:$0xff] %v850_v17  ;;  %v626_v20 = vpop.f32.mrf.mxu2  ;;  %v646_v21 = vpop.f32.mrf.mxu3 }
  0xe9   : > { %859 = vst [vmem:[%s1327_s24 + $0x38] sm:$0xff] %v827_v18  ;;  %v775_v22 = vmul.f32 %v1312_v24, %v626_v20  ;;  %v783_v23 = vmul.f32 %v1312_v24, %v646_v21 }
  0xea   : > { %867 = vst [vmem:[%s1327_s24 + $0x78] sm:$0xff] %v835_v19 }
  0xeb   : > { %v811_v26 = vadd.f32 %v1317_v25, %v775_v22  ;;  %v819_v27 = vadd.f32 %v1317_v25, %v783_v23 }
  0xed   : > { %v843_v28 = vmax.f32 %v811_v26, 0.0  ;;  %v851_v29 = vmax.f32 %v819_v27, 0.0 }
  0xef   : > { %875 = vst [vmem:[%s1327_s24 + $0xb8] sm:$0xff] %v843_v28 }
  0xf0   : > { %883 = vst [vmem:[%s1327_s24 + $0xf8] sm:$0xff] %v851_v29 }
  0xf1 PF: > { %s14_s17 = sadd.s32 1, %s1213_s17   ;;  %s1435_s15 = smov %s1209_s16 }
  0xf2   : > { %p11_p5 = scmp.ge.s32.totalorder %s14_s17, 4   ;;  %s1436_s16 = smov %s1438_s18 }
  0xf4   :  { %13 = sbr.rel (!%p11_p5) target bundleno = 2 (0x2), region = 83 }

</bundles_post_ra>
